<compile_context>
chip_gen: v6e
topology: v6e:2x2x1
jax: 0.10.0
libtpu: 0.0.40
codegen_flags: <defaults>
</compile_context>

<pallas_src>
import functools

import jax
import jax.numpy as jnp
from jax.experimental import pallas as pl
from jax.experimental.pallas import tpu as pltpu


def _autoencoder_kernel(x_ref,
                        w1_ref, b1_ref,
                        w2_ref, b2_ref,
                        w3_ref, b3_ref,
                        w4_ref, b4_ref,
                        o_ref):
    """Fused forward: all 4 Linear layers + tanh/relu on one x row-tile.

    Matmuls hit the MXU with f32 accumulation; tanh on the EUP, relu on the VPU.
    Storage dtype of x / o may be bf16; compute is always f32.
    """
    x = x_ref[...].astype(jnp.float32)

    # encode: Linear(A,16) -> tanh -> Linear(16,8) -> relu
    h = jnp.dot(x, w1_ref[...], preferred_element_type=jnp.float32) + b1_ref[...]
    h = jnp.tanh(h)
    h = jnp.dot(h, w2_ref[...], preferred_element_type=jnp.float32) + b2_ref[...]
    h = jnp.maximum(h, 0.0)

    # decode: Linear(8,16) -> tanh -> Linear(16,A) -> relu
    h = jnp.dot(h, w3_ref[...], preferred_element_type=jnp.float32) + b3_ref[...]
    h = jnp.tanh(h)
    h = jnp.dot(h, w4_ref[...], preferred_element_type=jnp.float32) + b4_ref[...]
    h = jnp.maximum(h, 0.0)

    o_ref[...] = h.astype(o_ref.dtype)


def _round_up(n, m):
    return ((n + m - 1) // m) * m


def _vmem_capacity_bytes():
    """Per-core VMEM capacity; conservative v7x fallback if the query fails."""
    try:
        return int(pltpu.get_tpu_info().vmem_capacity_bytes)
    except Exception:  # query unavailable -> assume the smallest part (v7x, 64 MiB)
        return 64 * 1024 * 1024


def _full_spec(arr):
    """Whole-array block (constant index map -> fetched once, not per step)."""
    return pl.BlockSpec(arr.shape, lambda i: (0, 0))


def autoencoder_forward(x, params, *, block_m=None, vmem_limit_bytes=None,
                        storage_dtype=None):
    """Run the fused autoencoder kernel.

    x: [B, A]. params: dict w1,b1,...,w4,b4 with weights [in, out] and biases
    [1, out] (f32). If storage_dtype is given (e.g. jnp.bfloat16), x and the
    output use that dtype in HBM (halves traffic); compute stays f32.
    """
    B, A = x.shape
    w1, b1 = params["w1"], params["b1"]
    w2, b2 = params["w2"], params["b2"]
    w3, b3 = params["w3"], params["b3"]
    w4, b4 = params["w4"], params["b4"]

    if storage_dtype is not None and x.dtype != storage_dtype:
        x = x.astype(storage_dtype)
    out_dtype = x.dtype

    # ---- Generation-aware VMEM budget (v5e/v6e: 128 MiB, v7x: 64 MiB).
    vmem_cap = _vmem_capacity_bytes()
    if vmem_limit_bytes is None:
        vmem_limit_bytes = int(vmem_cap * 0.75)
    tile_budget = int(vmem_limit_bytes * 0.85)  # headroom for compiler scratch

    # ---- VMEM footprint model (lane-padded to 128, real buffer counts):
    #   x tile  : block_m x round_up(A,128), 2 pipeline buffers
    #   out tile: block_m x round_up(A,128), 2 pipeline buffers
    #   weights : w1 [A,16] and w4 [16,A] dominate, double-buffered f32
    A_lanes = _round_up(A, 128)
    itemsize = jnp.dtype(out_dtype).itemsize
    bytes_per_row = A_lanes * 2 * 2 * itemsize
    weight_bytes = 2 * 4 * (_round_up(A, 8) * 128   # w1 (16 lanes pad to 128)
                            + 16 * A_lanes          # w4
                            + 8 * 1024)             # w2/w3/biases, padded, approx
    max_rows = max((tile_budget - weight_bytes) // max(bytes_per_row, 1), 8)

    # ---- Row tile: big enough to amortize the ~0.35us per-step overhead,
    # small enough for >=4 grid steps (>=2 per v7x TensorCore) when B allows.
    if block_m is None:
        block_m = min(1024, _round_up(max(pl.cdiv(B, 4), 8), 8))
    block_m = min(block_m, (max_rows // 8) * 8, _round_up(B, 8))
    if block_m >= B:
        block_m = B                       # single full-extent block (always legal)
    else:
        block_m = max(8, (block_m // 8) * 8)

    grid_m = pl.cdiv(B, block_m)          # ragged last block is fine: rows are
                                          # independent, OOB rows never written.

    out = pl.pallas_call(
        _autoencoder_kernel,
        out_shape=jax.ShapeDtypeStruct((B, A), out_dtype),
        grid_spec=pltpu.PrefetchScalarGridSpec(
            num_scalar_prefetch=0,
            grid=(grid_m,),
            in_specs=[
                pl.BlockSpec((block_m, A), lambda i: (i, 0)),
                _full_spec(w1), _full_spec(b1),
                _full_spec(w2), _full_spec(b2),
                _full_spec(w3), _full_spec(b3),
                _full_spec(w4), _full_spec(b4),
            ],
            out_specs=pl.BlockSpec((block_m, A), lambda i: (i, 0)),
        ),
        compiler_params=pltpu.CompilerParams(
            dimension_semantics=("parallel",),
            vmem_limit_bytes=vmem_limit_bytes),
    )(x, w1, b1, w2, b2, w3, b3, w4, b4)

    return out


def init_params(num_attributes, key):
    """Deterministic init mirroring nn.Linear default (uniform +-1/sqrt(fan_in)).

    Weights stored as [in, out]; biases as [1, out] (2-D for TPU layout).
    """
    dims = [(num_attributes, 16), (16, 8), (8, 16), (16, num_attributes)]
    params = {}
    keys = jax.random.split(key, 2 * len(dims))
    for idx, (fan_in, fan_out) in enumerate(dims):
        bound = 1.0 / jnp.sqrt(jnp.float32(fan_in))
        wk, bk = keys[2 * idx], keys[2 * idx + 1]
        params[f"w{idx + 1}"] = jax.random.uniform(
            wk, (fan_in, fan_out), jnp.float32, -bound, bound)
        params[f"b{idx + 1}"] = jax.random.uniform(
            bk, (1, fan_out), jnp.float32, -bound, bound)
    return params


def _reference_forward(x, p):
    h = jnp.tanh(x @ p["w1"] + p["b1"])
    h = jnp.maximum(h @ p["w2"] + p["b2"], 0.0)
    h = jnp.tanh(h @ p["w3"] + p["b3"])
    h = jnp.maximum(h @ p["w4"] + p["b4"], 0.0)
    return h


if __name__ == "__main__":
    key = jax.random.PRNGKey(0)
    k_x, k_p = jax.random.split(key)

    # Small demo shapes; batch deliberately not a multiple of block_m and
    # A < 128, exercising the ragged-last-block and full-width-A output paths.
    batch = 40
    num_attributes = 32

    x = jax.random.normal(k_x, (batch, num_attributes), jnp.float32)
    params = init_params(num_attributes, k_p)

    # f32 HBM path (exact match with the reference).
    fwd_f32 = jax.jit(autoencoder_forward)
    out = jax.block_until_ready(fwd_f32(x, params))
    ref = _reference_forward(x, params)
    assert out.shape == (batch, num_attributes)
    assert out.dtype == jnp.float32
    assert jnp.allclose(out, ref, atol=1e-5, rtol=1e-5)

    # bf16 HBM storage path (half the x/out bytes; f32 accumulation in-kernel).
    fwd_bf16 = jax.jit(
        functools.partial(autoencoder_forward, storage_dtype=jnp.bfloat16))
    out_bf16 = jax.block_until_ready(fwd_bf16(x, params))
    ref_bf16 = _reference_forward(
        x.astype(jnp.bfloat16).astype(jnp.float32), params)
    assert out_bf16.shape == (batch, num_attributes)
    assert out_bf16.dtype == jnp.bfloat16
    assert jnp.allclose(out_bf16.astype(jnp.float32), ref_bf16,
                        atol=3e-2, rtol=3e-2)

    print("KERNEL_OK")
</pallas_src>

<mosaic_0001>
module attributes {stable_mosaic.version = 11 : i64} {
  func.func @_autoencoder_kernel(%arg0: i32, %arg1: memref<16x32xf32, #tpu.memory_space<vmem>>, %arg2: memref<32x16xf32, #tpu.memory_space<vmem>>, %arg3: memref<1x16xf32, #tpu.memory_space<vmem>>, %arg4: memref<16x8xf32, #tpu.memory_space<vmem>>, %arg5: memref<1x8xf32, #tpu.memory_space<vmem>>, %arg6: memref<8x16xf32, #tpu.memory_space<vmem>>, %arg7: memref<1x16xf32, #tpu.memory_space<vmem>>, %arg8: memref<16x32xf32, #tpu.memory_space<vmem>>, %arg9: memref<1x32xf32, #tpu.memory_space<vmem>>, %arg10: memref<16x32xf32, #tpu.memory_space<vmem>>) attributes {dimension_semantics = [#tpu.dimension_semantics<parallel>], iteration_bounds = array<i64: 3>, scalar_prefetch = 0 : i64, scratch_operands = 0 : i64, tpu.core_type = #tpu.core_type<tc>, window_params = [{transform_indices = @transform_0, window_bounds = array<i64: 16, 32>}, {pipeline_mode = #tpu.pipeline_mode<synchronous>, transform_indices = @transform_1, window_bounds = array<i64: 32, 16>}, {pipeline_mode = #tpu.pipeline_mode<synchronous>, transform_indices = @transform_2, window_bounds = array<i64: 1, 16>}, {pipeline_mode = #tpu.pipeline_mode<synchronous>, transform_indices = @transform_3, window_bounds = array<i64: 16, 8>}, {pipeline_mode = #tpu.pipeline_mode<synchronous>, transform_indices = @transform_4, window_bounds = array<i64: 1, 8>}, {pipeline_mode = #tpu.pipeline_mode<synchronous>, transform_indices = @transform_5, window_bounds = array<i64: 8, 16>}, {pipeline_mode = #tpu.pipeline_mode<synchronous>, transform_indices = @transform_6, window_bounds = array<i64: 1, 16>}, {pipeline_mode = #tpu.pipeline_mode<synchronous>, transform_indices = @transform_7, window_bounds = array<i64: 16, 32>}, {pipeline_mode = #tpu.pipeline_mode<synchronous>, transform_indices = @transform_8, window_bounds = array<i64: 1, 32>}, {transform_indices = @transform_9, window_bounds = array<i64: 16, 32>}]} {
    %c0 = arith.constant 0 : index
    %c0_0 = arith.constant 0 : index
    %0 = vector.load %arg1[%c0, %c0_0] : memref<16x32xf32, #tpu.memory_space<vmem>>, vector<16x32xf32>
    %c0_1 = arith.constant 0 : index
    %c0_2 = arith.constant 0 : index
    %1 = vector.load %arg2[%c0_1, %c0_2] : memref<32x16xf32, #tpu.memory_space<vmem>>, vector<32x16xf32>
    %cst = arith.constant dense<0.000000e+00> : vector<16x16xf32>
    %2 = tpu.matmul %0, %1, %cst {dimension_numbers = #tpu.dot_dimension_numbers<[1], [0], [0], [1], [0, 0, 1, 1], [], []>} : vector<16x32xf32>, vector<32x16xf32>, vector<16x16xf32> -> vector<16x16xf32>
    %c0_3 = arith.constant 0 : index
    %c0_4 = arith.constant 0 : index
    %3 = vector.load %arg3[%c0_3, %c0_4] : memref<1x16xf32, #tpu.memory_space<vmem>>, vector<1x16xf32>
    %4 = vector.broadcast %3 : vector<1x16xf32> to vector<16x16xf32>
    %5 = arith.addf %2, %4 : vector<16x16xf32>
    %6 = math.tanh %5 : vector<16x16xf32>
    %c0_5 = arith.constant 0 : index
    %c0_6 = arith.constant 0 : index
    %7 = vector.load %arg4[%c0_5, %c0_6] : memref<16x8xf32, #tpu.memory_space<vmem>>, vector<16x8xf32>
    %cst_7 = arith.constant dense<0.000000e+00> : vector<16x8xf32>
    %8 = tpu.matmul %6, %7, %cst_7 {dimension_numbers = #tpu.dot_dimension_numbers<[1], [0], [0], [1], [0, 0, 1, 1], [], []>} : vector<16x16xf32>, vector<16x8xf32>, vector<16x8xf32> -> vector<16x8xf32>
    %c0_8 = arith.constant 0 : index
    %c0_9 = arith.constant 0 : index
    %9 = vector.load %arg5[%c0_8, %c0_9] : memref<1x8xf32, #tpu.memory_space<vmem>>, vector<1x8xf32>
    %10 = vector.broadcast %9 : vector<1x8xf32> to vector<16x8xf32>
    %11 = arith.addf %8, %10 : vector<16x8xf32>
    %cst_10 = arith.constant 0.000000e+00 : f32
    %12 = vector.broadcast %cst_10 : f32 to vector<16x8xf32>
    %13 = arith.maximumf %11, %12 : vector<16x8xf32>
    %c0_11 = arith.constant 0 : index
    %c0_12 = arith.constant 0 : index
    %14 = vector.load %arg6[%c0_11, %c0_12] : memref<8x16xf32, #tpu.memory_space<vmem>>, vector<8x16xf32>
    %cst_13 = arith.constant dense<0.000000e+00> : vector<16x16xf32>
    %15 = tpu.matmul %13, %14, %cst_13 {dimension_numbers = #tpu.dot_dimension_numbers<[1], [0], [0], [1], [0, 0, 1, 1], [], []>} : vector<16x8xf32>, vector<8x16xf32>, vector<16x16xf32> -> vector<16x16xf32>
    %c0_14 = arith.constant 0 : index
    %c0_15 = arith.constant 0 : index
    %16 = vector.load %arg7[%c0_14, %c0_15] : memref<1x16xf32, #tpu.memory_space<vmem>>, vector<1x16xf32>
    %17 = vector.broadcast %16 : vector<1x16xf32> to vector<16x16xf32>
    %18 = arith.addf %15, %17 : vector<16x16xf32>
    %19 = math.tanh %18 : vector<16x16xf32>
    %c0_16 = arith.constant 0 : index
    %c0_17 = arith.constant 0 : index
    %20 = vector.load %arg8[%c0_16, %c0_17] : memref<16x32xf32, #tpu.memory_space<vmem>>, vector<16x32xf32>
    %cst_18 = arith.constant dense<0.000000e+00> : vector<16x32xf32>
    %21 = tpu.matmul %19, %20, %cst_18 {dimension_numbers = #tpu.dot_dimension_numbers<[1], [0], [0], [1], [0, 0, 1, 1], [], []>} : vector<16x16xf32>, vector<16x32xf32>, vector<16x32xf32> -> vector<16x32xf32>
    %c0_19 = arith.constant 0 : index
    %c0_20 = arith.constant 0 : index
    %22 = vector.load %arg9[%c0_19, %c0_20] : memref<1x32xf32, #tpu.memory_space<vmem>>, vector<1x32xf32>
    %23 = vector.broadcast %22 : vector<1x32xf32> to vector<16x32xf32>
    %24 = arith.addf %21, %23 : vector<16x32xf32>
    %cst_21 = arith.constant 0.000000e+00 : f32
    %25 = vector.broadcast %cst_21 : f32 to vector<16x32xf32>
    %26 = arith.maximumf %24, %25 : vector<16x32xf32>
    %c0_22 = arith.constant 0 : index
    %c0_23 = arith.constant 0 : index
    %27 = vector.load %arg10[%c0_22, %c0_23] : memref<16x32xf32, #tpu.memory_space<vmem>>, vector<16x32xf32>
    tpu.vector_store %arg10[%c0_22, %c0_23], %26 {strides = array<i32>} : memref<16x32xf32, #tpu.memory_space<vmem>>, vector<16x32xf32>,
    return
  }
  func.func @transform_0(%arg0: i32) -> (i32, i32) {
    %c0_i32 = arith.constant 0 : i32
    %c0_i32_0 = arith.constant 0 : i32
    return %arg0, %c0_i32 : i32, i32
  }
  func.func @transform_1(%arg0: i32) -> (i32, i32) {
    %c0_i32 = arith.constant 0 : i32
    %c0_i32_0 = arith.constant 0 : i32
    %c0_i32_1 = arith.constant 0 : i32
    return %c0_i32, %c0_i32_0 : i32, i32
  }
  func.func @transform_2(%arg0: i32) -> (i32, i32) {
    %c0_i32 = arith.constant 0 : i32
    %c0_i32_0 = arith.constant 0 : i32
    %c0_i32_1 = arith.constant 0 : i32
    return %c0_i32, %c0_i32_0 : i32, i32
  }
  func.func @transform_3(%arg0: i32) -> (i32, i32) {
    %c0_i32 = arith.constant 0 : i32
    %c0_i32_0 = arith.constant 0 : i32
    %c0_i32_1 = arith.constant 0 : i32
    return %c0_i32, %c0_i32_0 : i32, i32
  }
  func.func @transform_4(%arg0: i32) -> (i32, i32) {
    %c0_i32 = arith.constant 0 : i32
    %c0_i32_0 = arith.constant 0 : i32
    %c0_i32_1 = arith.constant 0 : i32
    return %c0_i32, %c0_i32_0 : i32, i32
  }
  func.func @transform_5(%arg0: i32) -> (i32, i32) {
    %c0_i32 = arith.constant 0 : i32
    %c0_i32_0 = arith.constant 0 : i32
    %c0_i32_1 = arith.constant 0 : i32
    return %c0_i32, %c0_i32_0 : i32, i32
  }
  func.func @transform_6(%arg0: i32) -> (i32, i32) {
    %c0_i32 = arith.constant 0 : i32
    %c0_i32_0 = arith.constant 0 : i32
    %c0_i32_1 = arith.constant 0 : i32
    return %c0_i32, %c0_i32_0 : i32, i32
  }
  func.func @transform_7(%arg0: i32) -> (i32, i32) {
    %c0_i32 = arith.constant 0 : i32
    %c0_i32_0 = arith.constant 0 : i32
    %c0_i32_1 = arith.constant 0 : i32
    return %c0_i32, %c0_i32_0 : i32, i32
  }
  func.func @transform_8(%arg0: i32) -> (i32, i32) {
    %c0_i32 = arith.constant 0 : i32
    %c0_i32_0 = arith.constant 0 : i32
    %c0_i32_1 = arith.constant 0 : i32
    return %c0_i32, %c0_i32_0 : i32, i32
  }
  func.func @transform_9(%arg0: i32) -> (i32, i32) {
    %c0_i32 = arith.constant 0 : i32
    %c0_i32_0 = arith.constant 0 : i32
    return %arg0, %c0_i32 : i32, i32
  }
}

</mosaic_0001>

<bundles_post_ra>
// kernel: autoencoder_forward.1
= control target key start
LH: loop header
LB: loop body
LE: loop exit
PB: predicated region body
PF: predicated region fallthrough
CT: control target
= control target key end

     0   :  { %s1270_s30 = smov 0   ;;  %s1272_s10 = smov 0   ;;  %s1400_s0 = inlined_call_operand.vmem [shape: f32[40,32], index: 0, kind: input, shape index: {}]   ;;  %s1401_s1 = inlined_call_operand.vmem [shape: f32[32,16], index: 1, kind: input, shape index: {}]   ;;  %s1402_s2 = inlined_call_operand.vmem [shape: f32[1,16], index: 2, kind: input, shape index: {}]   ;;  %s1403_s3 = inlined_call_operand.vmem [shape: f32[16,8], index: 3, kind: input, shape index: {}]   ;;  %s1404_s4 = inlined_call_operand.vmem [shape: f32[1,8], index: 4, kind: input, shape index: {}]   ;;  %s1405_s5 = inlined_call_operand.vmem [shape: f32[8,16], index: 5, kind: input, shape index: {}]   ;;  %s1406_s6 = inlined_call_operand.vmem [shape: f32[1,16], index: 6, kind: input, shape index: {}]   ;;  %s1407_s7 = inlined_call_operand.vmem [shape: f32[16,32], index: 7, kind: input, shape index: {}]   ;;  %s1408_s8 = inlined_call_operand.vmem [shape: f32[1,32], index: 8, kind: input, shape index: {}]   ;;  %s1409_s9 = inlined_call_operand.vmem [shape: f32[40,32], index: 9, kind: output, shape index: {}]  }
   0x1   :  { %s1274_s11 = smov 0  }
   0x2 LB: > { %s1283_s12 = sadd.s32 4294967295, %s1186_s11   ;;  %s1285_s13 = sadd.s32 1, %s1186_s11   ;;  %s1186_s11 = sphi %s1274_s11, %s1413_s11   ;;  %s1182_s10 = sphi %s1272_s10, %s1412_s10   ;;  %s1178_s30 = sphi %s1270_s30, %s1411_s30  }
   0x3   : > { %s217_s14 = ssub.s32 %s1186_s11, %s1285_s13  ;;  %s220_s15 = sadd.s32 1, %s1182_s10 }
   0x4   : > { %p218_p0 = scmp.eq.s32.totalorder %s217_s14, 0  ;;  %p230_p1 = scmp.ne.s32.totalorder %s1182_s10, %s1178_s30 }
   0x5   : > { %p231_p2 = scmp.eq.s32.totalorder %s1283_s12, 2  ;;  %p953_p3 = scmp.ge.s32.totalorder %s1186_s11, 1 }
   0x6   : > { %s1293_s16 = scalar_select %p218_p0, %s1182_s10, %s220_s15  }
   0x7   : > { %p1295_p4 = por %p231_p2, %p230_p1  ;;  %p296_p5 = scmp.lt.s32.totalorder %s1186_s11, 4 }
   0x9   : > { %p297_p6 = pnand %p953_p3, %p296_p5 }
   0xa   : > { %s1306_s22 = sshll.u32 (!%p297_p6), %s1283_s12, 1  ;;  %s332_s19 = sand.u32 (!%p297_p6), 1, %s1178_s30  }
   0xb   : > { %300 = sbr.rel (%p297_p6) target bundleno = 888 (0x378), region = 56  ;;  %p340_p7 = scmp.lt.s32.totalorder (!%p297_p6), %s1306_s22, 4 }
   0xc   : > { %s954_s23 = sshll.u32 (!%p297_p6), %s332_s19, 4 }
   0xd   : > { %s1353_s24 = scalar_lea.vmem (!%p297_p6), [#allocation2], %s954_s23  }
  0x10   : > { %v359_v0 = vld [vmem:[%s1401_s1 + $0x18] sm:$0xff]  ;;  %v358_v1 = vld [vmem:[%s1401_s1 + $0x10] sm:$0xff]  ;;  %v357_v2 = vld [vmem:[%s1401_s1 + $0x8] sm:$0xff]  ;;  %s341_s25 = scalar_select %p340_p7, %s1306_s22, 4  ;;  %vm367_vm0 = vcmask 261120   ;;  %vm460_vm1 = vcmask 130048  }
  0x11   : > { %1006 = vmatprep.subr.mxu0 %v359_v0  ;;  %v356_v3 = vld [vmem:[%s1401_s1] sm:$0xff]  ;;  %v452_v6 = vld [vmem:[%s1403_s3 + $0x8] sm:$0xff]  ;;  %vm552_vm2 = vcmask 64512   ;;  %s738_s30 = ssub.s32 (%p1295_p4), 5, %s1306_s22 }
  0x12   : > { %1007 = vmatpush3.msra.mxu0 %v359_v0  ;;  %s956_s28 = sshll.u32 %s341_s25, 3  ;;  %v451_v7 = vld [vmem:[%s1403_s3] sm:$0xff]  ;;  %1017 = vmatprep.subr.mxu1 %v452_v6  ;;  %v637_v23 = vld [vmem:[%s1407_s7 + $0x8] sm:$0xff]  ;;  %s986_s25 = sshll.u32 (%p1295_p4), %s1283_s12, 4 }
  0x13   : > { %1008 = vmatprep.subr.mxu0 %v358_v1  ;;  %s343_s14 = scalar_lea.vmem %s1400_s0, %s956_s28  ;;  %1018 = vmatpush3.msra.mxu1 %v452_v6  ;;  %v957_v8 = vld [vmem:[%s1402_s2] ss:$0 sm:$0xff]  ;;  %p739_p8 = scmp.lt.s32.totalorder (%p1295_p4), %s738_s30, 2 }
  0x14   : > { %1009 = vmatpush3.msra.mxu0 %v358_v1  ;;  %v354_v4 = vld [vmem:[%s343_s14] sm:$0xff]  ;;  %v355_v5 = vld [vmem:[%s343_s14 + $0x8] sm:$0xff]  ;;  %1019 = vmatprep.subr.mxu1 %v451_v7  ;;  %s1366_s28 = scalar_lea.vmem (%p1295_p4), %s1409_s9, %s986_s25  }
  0x15   : > { %1010 = vmatprep.subr.mxu0 %v357_v2  ;;  %1014 = vmatprep.mubr.msk.f32.mxu0 %vm367_vm0, %v354_v4  ;;  %v544_v15 = vld [vmem:[%s1405_s5] sm:$0xff] }
  0x16   : > { %1011 = vmatpush3.msra.mxu0 %v357_v2  ;;  %1020 = vmatpush3.msra.mxu1 %v451_v7  ;;  %v960_v16 = vld [vmem:[%s1404_s4] ss:$0 sm:$0xff] }
  0x17   : > { %1012 = vmatprep.subr.mxu0 %v356_v3  ;;  %1024 = vmatprep.subr.mxu1 %v544_v15  ;;  %v636_v24 = vld [vmem:[%s1407_s7] sm:$0xff] }
  0x18   : > { %1013 = vmatpush3.msra.mxu0 %v356_v3  ;;  %v963_v25 = vld [vmem:[%s1406_s6] ss:$0 sm:$0xff] }
  0x19   : > { %1015 = vmatmul.mubr.msk.f32.vlgmr.msra.gmra.mxu0 %vm367_vm0, %v355_v5  ;;  %1029 = vmatprep.subr.mxu0 %v637_v23  ;;  %v966_v32 = vld [vmem:[%s1408_s8] ss:$0 sm:$0xff] }
  0x1a   : > { %1030 = vmatpush3.msra.mxu0 %v637_v23 }
  0x1b   : > { %1031 = vmatprep.subr.mxu0 %v636_v24 }
  0x1c   : > { %1032 = vmatpush3.msra.mxu0 %v636_v24 }
  0xd9   : > { %v1016_v9 = vpop.f32.mrf.mxu0 }
  0xda   : > { %v446_v10 = vadd.f32 %v1016_v9, %v957_v8 }
  0xdb   : > { %v440_v11 = vpop.f32.mrf.mxu0 }
  0xdc   : > { %v441_v12 = vadd.f32 %v957_v8, %v440_v11 }
  0xde   : > { %1124 = vtanh.f32 %v441_v12 }
  0xdf   : > { %1126 = vtanh.f32 %v446_v10 }
  0xeb   : > { %v1125_v13 = vpop.eup %1124 }
  0xec   : > { %v1127_v14 = vpop.eup %1126  ;;  %1021 = vmatprep.mubr.msk.f32.mxu1 %vm460_vm1, %v1125_v13 }
  0xed   : > { %1022 = vmatmul.mubr.msk.f32.vlgmr.msra.gmra.mxu1 %vm460_vm1, %v1127_v14 }
  0xee   : > { %1025 = vmatpush3.msra.mxu1 %v544_v15 }
 0x1ad   : > { %v1023_v17 = vpop.f32.mrf.mxu1 }
 0x1ae   : > { %v539_v18 = vadd.f32 %v1023_v17, %v960_v16 }
 0x1af   : > { %v533_v19 = vpop.f32.mrf.mxu1 }
 0x1b0   : > { %v534_v20 = vadd.f32 %v960_v16, %v533_v19  ;;  %v543_v22 = vmax.f32 %v539_v18, 0.0 }
 0x1b2   : > { %v542_v21 = vmax.f32 %v534_v20, 0.0 }
 0x1b4   : > { %1026 = vmatprep.mubr.msk.f32.mxu1 %vm552_vm2, %v542_v21 }
 0x1b5   : > { %1027 = vmatmul.mubr.msk.f32.vlgmr.msra.gmra.mxu1 %vm552_vm2, %v543_v22 }
 0x275   : > { %v1028_v26 = vpop.f32.mrf.mxu1 }
 0x276   : > { %v631_v27 = vadd.f32 %v1028_v26, %v963_v25 }
 0x277   : > { %v625_v28 = vpop.f32.mrf.mxu1 }
 0x278   : > { %v626_v29 = vadd.f32 %v963_v25, %v625_v28 }
 0x27a   : > { %1128 = vtanh.f32 %v626_v29 }
 0x27b   : > { %1130 = vtanh.f32 %v631_v27 }
 0x287   : > { %v1129_v30 = vpop.eup %1128 }
 0x288   : > { %v1131_v31 = vpop.eup %1130  ;;  %1033 = vmatprep.mubr.msk.f32.mxu0 %vm460_vm1, %v1129_v30 }
 0x289   : > { %1034 = vmatmul.mubr.msk.f32.vlgmr.msra.gmra.mxu0 %vm460_vm1, %v1131_v31 }
 0x349   : > { %v1035_v33 = vpop.f32.mrf.mxu0 }
 0x34a   : > { %v723_v34 = vadd.f32 %v1035_v33, %v966_v32 }
 0x34b   : > { %v717_v35 = vpop.f32.mrf.mxu0 }
 0x34c   : > { %v727_v36 = vmax.f32 %v723_v34, 0.0  ;;  %v718_v37 = vadd.f32 %v966_v32, %v717_v35  ;;  %736 = sbr.rel (!%p1295_p4) target bundleno = 888 (0x378), region = 60 }
 0x34e   : > { %729 = vst.msk [vmem:[%s1353_s24 + $0x8] sm:$0xff] %vm367_vm0, %v727_v36  ;;  %v726_v38 = vmax.f32 %v718_v37, 0.0 }
 0x350   : > { %728 = vst.msk [vmem:[%s1353_s24] sm:$0xff] %vm367_vm0, %v726_v38 }
 0x351   : > { %s1415_s30 = smov (!%p739_p8, %s738_s30), 2 }
 0x352   : > { %s971_s29 = sshll.u32 %s1415_s30, 7 }
 0x353   : > { %p974_p9 = scmp.eq.s32.totalorder %s971_s29, 0 }
 0x354   : > { %s1372_s11 = sshrl.u32 (!%p974_p9), %s1415_s30, 1 }
 0x355   : > { %747 = sbr.rel (%p974_p9) target bundleno = 888 (0x378), region = 64  ;;  %p975_p10 = scmp.le.s32.totalorder (!%p974_p9), %s1372_s11, 0 }
 0x35a   : > { %906 = sbr.rel (%p975_p10) target bundleno = 871 (0x367), region = 140  ;;  %s1188_s12 = smov (!%p975_p10), %s1366_s28  }
 0x35b   : > { %s1192_s17 = smov (!%p975_p10), %s1353_s24   ;;  %s1196_s22 = smov (!%p975_p10), 0  }
 0x35c   : > { %s1200_s14 = smov (!%p975_p10), 0  }
 0x35f LB: >> { %v812_v39 = vld [vmem:[%s1194_s17] sm:$0xff]  ;;  %v814_v40 = vld [vmem:[%s1194_s17 + $0x8] sm:$0xff]  ;;  %s816_s15 = sadd.s32 1, %s1198_s22  ;;  %s806_s14 = sadd.s32 1, %s1202_s14   ;;  %s1202_s14 = sphi %s1200_s14, %s806_s14   ;;  %s1198_s22 = sphi %s1196_s22, %s1197_s22   ;;  %s1194_s17 = sphi %s1192_s17, %s821_s17   ;;  %s1190_s12 = sphi %s1188_s12, %s822_s12  }
 0x360   : >> { %813 = vst [vmem:[%s1190_s12] sm:$0xff] %v812_v39  ;;  %815 = vst [vmem:[%s1190_s12 + $0x8] sm:$0xff] %v814_v40  ;;  %p817_p11 = scmp.ge.s32.totalorder %s816_s15, %s1372_s11  ;;  %p805_p12 = scmp.ge.s32.totalorder %s806_s14, %s1372_s11 }
 0x362   : >> { %s1417_s15 = smov (%p817_p11, %s816_s15), 0  ;;  %808 = sbr.rel (!%p805_p12) target bundleno = 863 (0x35f), region = 146 }
 0x363   : >> { %s976_s18 = sshll.u32 %s1417_s15, 4  ;;  %s1197_s22 = smov %s1417_s15  }
 0x364   : >> { %s821_s17 = scalar_lea.vmem %s1353_s24, %s976_s18 [#allocation2]   ;;  %s822_s12 = scalar_lea.vmem %s1366_s28, %s976_s18  }
 0x367 PF: > { %s1382_s19 = sand.u32 1, %s1415_s30   ;;  %s987_s20 = sshll.u32 %s1372_s11, 4 }
 0x368   : > { %s827_s21 = scalar_lea.vmem %s1353_s24, %s987_s20 [#allocation2]   ;;  %s829_s23 = scalar_lea.vmem %s1366_s28, %s987_s20  }
 0x369   : > { %p981_p13 = scmp.le.s32.totalorder %s1382_s19, 0 }
 0x36a   : > { %s1204_s25 = smov (!%p981_p13), %s829_s23   ;;  %s1208_s26 = smov (!%p981_p13), %s827_s21  }
 0x36b   : > { %920 = sbr.rel (%p981_p13) target bundleno = 888 (0x378), region = 151  ;;  %s1212_s27 = smov (!%p981_p13), 0  }
 0x36c   : > { %s1216_s29 = smov (!%p981_p13), 0  }
 0x370 LB: >> { %v839_v41 = vld [vmem:[%s1210_s26] sm:$0xff]  ;;  %s841_s30 = sadd.s32 1, %s1214_s27  ;;  %s833_s29 = sadd.s32 1, %s1218_s29   ;;  %s1218_s29 = sphi %s1216_s29, %s833_s29   ;;  %s1214_s27 = sphi %s1212_s27, %s1213_s27   ;;  %s1210_s26 = sphi %s1208_s26, %s846_s26   ;;  %s1206_s25 = sphi %s1204_s25, %s847_s25  }
 0x371   : >> { %840 = vst [vmem:[%s1206_s25] sm:$0xff] %v839_v41  ;;  %p842_p0 = scmp.ge.s32.totalorder %s841_s30, %s1382_s19  ;;  %p832_p1 = scmp.ge.s32.totalorder %s833_s29, %s1382_s19 }
 0x373   : >> { %s1419_s30 = smov (%p842_p0, %s841_s30), 0  ;;  %835 = sbr.rel (!%p832_p1) target bundleno = 880 (0x370), region = 157 }
 0x374   : >> { %s982_s24 = sshll.u32 %s1419_s30, 3  ;;  %s1213_s27 = smov %s1419_s30  }
 0x375   : >> { %s846_s26 = scalar_lea.vmem %s827_s21, %s982_s24 [#allocation2]   ;;  %s847_s25 = scalar_lea.vmem %s829_s23, %s982_s24  }
 0x378 PF: > { %p16_p2 = scmp.ge.s32.totalorder %s1285_s13, 5   ;;  %s1411_s30 = smov %s1182_s10 }
 0x379   : > { %s1412_s10 = smov %s1293_s16  ;;  %s1413_s11 = smov %s1285_s13 }
 0x37a   :  { %18 = sbr.rel (!%p16_p2) target bundleno = 2 (0x2), region = 168 }

</bundles_post_ra>
